<compile_context>
chip_gen: v7x
topology: tpu7x:2x2x1
jax: 0.10.0
libtpu: 0.0.40
codegen_flags: <defaults>
</compile_context>

<pallas_src>
import functools
import math

import jax
import jax.numpy as jnp
from jax.experimental import pallas as pl
from jax.experimental.pallas import tpu as pltpu


def make_positional_encoding(d_model: int, max_len: int = 5000) -> jnp.ndarray:
    """pe buffer identical to the PyTorch __init__, shape (max_len, 1, d_model), float32."""
    if d_model % 2 != 0:
        raise ValueError("d_model must be even (sin/cos interleave), as in the PyTorch module.")
    position = jnp.arange(0, max_len, dtype=jnp.float32)[:, None]              # (max_len, 1)
    div_term = jnp.exp(
        jnp.arange(0, d_model, 2, dtype=jnp.float32) * (-math.log(10000.0) / d_model)
    )                                                                           # (d_model/2,)
    args = position * div_term                                                  # (max_len, d_model/2)
    pe = jnp.zeros((max_len, d_model), dtype=jnp.float32)
    pe = pe.at[:, 0::2].set(jnp.sin(args))
    pe = pe.at[:, 1::2].set(jnp.cos(args))
    return pe[:, None, :]                                                       # (max_len, 1, d_model)


# ---------------------------------------------------------------------------
# Kernels: f32 add (PyTorch promote-then-round), downcast on store.
# ---------------------------------------------------------------------------

def _add_pe_flat_kernel(x_ref, pe_ref, o_ref, *, nb):
    # x_ref / o_ref: (ts, nb*D) in x.dtype;  pe_ref: (ts, D) float32.
    pe = pe_ref[...]
    if nb > 1:
        # Lane-replicate pe across the nb batches covered by this block.  D is a
        # multiple of 128 on this path, so these are aligned vector copies fully
        # hidden under the (nb x larger) x-tile DMA.
        pe = jnp.concatenate([pe] * nb, axis=-1)
    o_ref[...] = (x_ref[...].astype(jnp.float32) + pe).astype(o_ref.dtype)


def _add_pe_3d_kernel(x_ref, pe_ref, o_ref):
    # x_ref / o_ref: (ts, bt, D) in x.dtype;  pe_ref: (ts, D) float32.
    pe = pe_ref[...][:, None, :]                    # broadcast over the batch (sublane) axis
    o_ref[...] = (x_ref[...].astype(jnp.float32) + pe).astype(o_ref.dtype)


# ---------------------------------------------------------------------------
# Tile sizing helpers.
# ---------------------------------------------------------------------------

def _round_up(a: int, b: int) -> int:
    return (a + b - 1) // b * b


def _round_down(a: int, b: int) -> int:
    return a // b * b


def _sublane_tile(dtype) -> int:
    # sublane tile per dtype: 8 (f32), 16 (bf16/f16), 32 (int8/fp8)
    return max(8, 32 // jnp.dtype(dtype).itemsize)


def _device_budget():
    """Returns (target x-block bytes, scoped vmem limit or None) per TPU generation."""
    try:
        kind = jax.devices()[0].device_kind.lower()
    except Exception:
        kind = ""
    if "v7" in kind:
        return 4 << 20, 48 << 20          # 64 MiB VMEM per TC: cap residency well below
    if "v5" in kind or "v6" in kind:
        return 6 << 20, 64 << 20          # 128 MiB physical VMEM; raise the scoped default
    return 2 << 20, None                  # unknown/older chip: stay inside default scoped VMEM


# ---------------------------------------------------------------------------
# Forward wrapper.
# ---------------------------------------------------------------------------

def positional_encoding_forward(x: jnp.ndarray, pe: jnp.ndarray) -> jnp.ndarray:
    """x: (S, B, D);  pe: (max_len, 1, D) float32.  Returns x + pe[:S] (module forward)."""
    S, B, D = x.shape
    max_len = pe.shape[0]
    if pe.shape != (max_len, 1, D):
        raise ValueError("pe must have shape (max_len, 1, d_model), as registered by the module.")
    if S > max_len:
        raise ValueError("sequence length exceeds max_len (the PyTorch module would fail too).")

    itemsize = jnp.dtype(x.dtype).itemsize
    sub = _sublane_tile(x.dtype)          # seq-tile granularity (always a multiple of 8 → f32 pe ok)
    target, vmem_limit = _device_budget()

    pe2d = pe.reshape(max_len, D)         # metadata-only squeeze; stays float32 in HBM
    pe_rows = max_len
    if S < 8:
        # Degenerate tiny-S case: slice pe so the (ts, D) pe block equals the full buffer
        # extent (avoids a sub-8 sublane block).  Copies fewer than 8*D floats.
        pe2d = pe2d[:S]
        pe_rows = S

    flatten = (D % 128 == 0)
    d_pad = _round_up(D, 128)

    if flatten:
        # 2-D view (S, B*D): lane-dense for any B.  nb = batches per lane block; capped so a
        # minimum-height block fits the budget and the in-kernel pe replication stays bounded.
        nb = B
        if B > 1:
            nb = min(B, max(1, target // (sub * D * itemsize)), 128)
        row_bytes = nb * D * itemsize
        batch_grid = pl.cdiv(B, nb)
    else:
        # 3-D (ts, bt, D) blocks; tile the batch axis only when a minimum-height block
        # would blow the budget.  D < 128 lane tiles are partially masked — acceptable,
        # these are small-model shapes.
        bt = B
        if B > sub and sub * _round_up(B, sub) * d_pad * itemsize > target:
            bt = min(B, max(sub, _round_down(target // (sub * d_pad * itemsize), sub)))
        row_bytes = _round_up(bt, sub) * d_pad * itemsize
        batch_grid = pl.cdiv(B, bt)

    # Seq tile: budget against padded bytes, round to the dtype sublane tile, never taller
    # than the array (the last block is a Pallas-masked partial edge block).
    rows = max(sub, _round_down(max(1, target // row_bytes), sub))
    ts = min(rows, S, pe_rows)
    if ts >= 8:
        ts = _round_down(ts, 8)
        if ts >= sub:
            ts = _round_down(ts, sub)
    seq_grid = pl.cdiv(S, ts)
    grid = (seq_grid, batch_grid)

    cost = pl.CostEstimate(
        flops=S * B * D,
        transcendentals=0,
        bytes_accessed=2 * S * B * D * itemsize + S * D * 4,
    )
    cp_kwargs = dict(dimension_semantics=("parallel", "parallel"))
    if vmem_limit is not None:
        cp_kwargs["vmem_limit_bytes"] = vmem_limit
    compiler_params = pltpu.CompilerParams(**cp_kwargs)

    if flatten:
        x2 = x.reshape(S, B * D)          # contiguous merge of minor dims: free
        out2 = pl.pallas_call(
            functools.partial(_add_pe_flat_kernel, nb=nb),
            out_shape=jax.ShapeDtypeStruct((S, B * D), x.dtype),
            grid_spec=pltpu.PrefetchScalarGridSpec(
                num_scalar_prefetch=0,
                grid=grid,
                in_specs=[
                    pl.BlockSpec((ts, nb * D), lambda i, j: (i, j)),
                    pl.BlockSpec((ts, D), lambda i, j: (i, 0)),
                ],
                out_specs=pl.BlockSpec((ts, nb * D), lambda i, j: (i, j)),
            ),
            compiler_params=compiler_params,
            cost_estimate=cost,
        )(x2, pe2d)
        return out2.reshape(S, B, D)

    # TODO(synk): if D % 128 != 0 AND B*D is enormous, a 128-aligned lane split is not
    # expressible here; we accept a single tall block per seq tile instead.
    return pl.pallas_call(
        _add_pe_3d_kernel,
        out_shape=jax.ShapeDtypeStruct((S, B, D), x.dtype),
        grid_spec=pltpu.PrefetchScalarGridSpec(
            num_scalar_prefetch=0,
            grid=grid,
            in_specs=[
                pl.BlockSpec((ts, bt, D), lambda i, j: (i, j, 0)),
                pl.BlockSpec((ts, D), lambda i, j: (i, 0)),
            ],
            out_specs=pl.BlockSpec((ts, bt, D), lambda i, j: (i, j, 0)),
        ),
        compiler_params=compiler_params,
        cost_estimate=cost,
    )(x, pe2d)


if __name__ == "__main__":
    max_len = 5000
    seq_len = 8
    batch = 2
    key = jax.random.PRNGKey(0)

    # --- primary check: module-like small shape (3-D path, D not a multiple of 128) ---
    d_model = 32
    x = jax.random.normal(key, (seq_len, batch, d_model), dtype=jnp.float32)
    pe = make_positional_encoding(d_model, max_len)      # deterministic buffer (module __init__)
    out = jax.block_until_ready(positional_encoding_forward(x, pe))
    ref = x + pe[:seq_len]
    assert out.shape == (seq_len, batch, d_model)
    assert jnp.allclose(out, ref, atol=1e-6, rtol=1e-6)

    # --- secondary check: lane-dense flattened path (D % 128 == 0) ---
    d_model2 = 128
    x2 = jax.random.normal(jax.random.PRNGKey(0), (seq_len, batch, d_model2), dtype=jnp.float32)
    pe2 = make_positional_encoding(d_model2, max_len)
    out2 = jax.block_until_ready(positional_encoding_forward(x2, pe2))
    ref2 = x2 + pe2[:seq_len]
    assert out2.shape == (seq_len, batch, d_model2)
    assert jnp.allclose(out2, ref2, atol=1e-6, rtol=1e-6)

    print("KERNEL_OK")
</pallas_src>

<mosaic_0001>
module attributes {stable_mosaic.version = 11 : i64} {
  func.func @_add_pe_3d_kernel(%arg0: i32, %arg1: i32, %arg2: memref<8x2x32xf32, #tpu.memory_space<vmem>>, %arg3: memref<8x32xf32, #tpu.memory_space<vmem>>, %arg4: memref<8x2x32xf32, #tpu.memory_space<vmem>>) attributes {dimension_semantics = [#tpu.dimension_semantics<parallel>, #tpu.dimension_semantics<parallel>], iteration_bounds = array<i64: 1, 1>, scalar_prefetch = 0 : i64, scratch_operands = 0 : i64, tpu.core_type = #tpu.core_type<tc>, window_params = [{transform_indices = @transform_0, window_bounds = array<i64: 8, 2, 32>}, {transform_indices = @transform_1, window_bounds = array<i64: 8, 32>}, {transform_indices = @transform_2, window_bounds = array<i64: 8, 2, 32>}]} {
    %c0 = arith.constant 0 : index
    %c0_0 = arith.constant 0 : index
    %0 = vector.load %arg3[%c0, %c0_0] : memref<8x32xf32, #tpu.memory_space<vmem>>, vector<8x32xf32>
    %1 = vector.shape_cast %0 : vector<8x32xf32> to vector<8x1x32xf32>
    %c0_1 = arith.constant 0 : index
    %c0_2 = arith.constant 0 : index
    %c0_3 = arith.constant 0 : index
    %2 = vector.load %arg2[%c0_1, %c0_2, %c0_3] : memref<8x2x32xf32, #tpu.memory_space<vmem>>, vector<8x2x32xf32>
    %3 = vector.broadcast %1 : vector<8x1x32xf32> to vector<8x2x32xf32>
    %4 = arith.addf %2, %3 : vector<8x2x32xf32>
    %c0_4 = arith.constant 0 : index
    %c0_5 = arith.constant 0 : index
    %c0_6 = arith.constant 0 : index
    %5 = vector.load %arg4[%c0_4, %c0_5, %c0_6] : memref<8x2x32xf32, #tpu.memory_space<vmem>>, vector<8x2x32xf32>
    tpu.vector_store %arg4[%c0_4, %c0_5, %c0_6], %4 {strides = array<i32>} : memref<8x2x32xf32, #tpu.memory_space<vmem>>, vector<8x2x32xf32>,
    return
  }
  func.func @transform_0(%arg0: i32, %arg1: i32) -> (i32, i32, i32) {
    %c0_i32 = arith.constant 0 : i32
    %c0_i32_0 = arith.constant 0 : i32
    return %arg0, %arg1, %c0_i32 : i32, i32, i32
  }
  func.func @transform_1(%arg0: i32, %arg1: i32) -> (i32, i32) {
    %c0_i32 = arith.constant 0 : i32
    %c0_i32_0 = arith.constant 0 : i32
    return %arg0, %c0_i32 : i32, i32
  }
  func.func @transform_2(%arg0: i32, %arg1: i32) -> (i32, i32, i32) {
    %c0_i32 = arith.constant 0 : i32
    %c0_i32_0 = arith.constant 0 : i32
    return %arg0, %arg1, %c0_i32 : i32, i32, i32
  }
}

</mosaic_0001>

<bundles_post_ra>
// kernel: tpu_custom_call.1
= control target key start
LH: loop header
LB: loop body
LE: loop exit
PB: predicated region body
PF: predicated region fallthrough
CT: control target
= control target key end

     0   :  { %v18_v1 = vlaneseq  ;;  %v172_v2 = vmov 1966171168   ;;  %s238_s0 = inlined_call_operand.vmem [shape: f32[8,2,32], index: 0, kind: input, shape index: {}]   ;;  %s239_s1 = inlined_call_operand.vmem [shape: f32[5000,32], index: 1, kind: input, shape index: {}]   ;;  %s240_s2 = inlined_call_operand.hbm [shape: f32[8,2,32], index: 2, kind: output, shape index: {}]  }
   0x1   :  { %v12_v0 = vld [vmem:[%s239_s1] sm:$0xff]  ;;  %v16_v3 = vunpack.c.l.s4 %v172_v2 }
   0x2   :  { %v19_v4 = vshrl.u32 %v18_v1, 7  ;;  %v14_v6 = vcombine.high %v12_v0, %v12_v0 }
   0x3   :  { %v17_v5 = vunpack.c.0.s8 %v16_v3 }
   0x4   :  { %7 = vsyncpa [#allocation3], 0  ;;  %v73_v9 = vsub.s32 0, %v19_v4  ;;  %v63_v15 = vld [vmem:[%s238_s0] sm:$0x3]  ;;  %vm119_vm0 = vcmask 254976  }
   0x5   :  { %v20_v7 = vsub.s32 %v17_v5, %v19_v4  ;;  %v67_v19 = vld [vmem:[%s238_s0 + $0x8] sm:$0x3]  ;;  %v64_v21 = vld [vmem:[%s238_s0 + $0x2] sm:$0x3]  ;;  %v65_v22 = vld [vmem:[%s238_s0 + $0x4] sm:$0x3] }
   0x6   :  { %v68_v29 = vld [vmem:[%s238_s0 + $0xa] sm:$0x3]  ;;  %v69_v30 = vld [vmem:[%s238_s0 + $0xc] sm:$0x3]  ;;  %v66_v31 = vld [vmem:[%s238_s0 + $0x6] sm:$0x3] }
   0x7   :  { %v21_v8 = vrot.slane %v12_v0, %v20_v7  ;;  %v28_v10 = vrot.slane %v14_v6, %v20_v7  ;;  %v70_v39 = vld [vmem:[%s238_s0 + $0xe] sm:$0x3]  ;;  %s173_s26 = smov [#allocation2]  }
   0x8   :  { %s133_s27 = sshll.u32 %s173_s26, 4  ;;  %s134_s27 = int_to_ptr.vmem [resolvable:$true] %s133_s27 }
   0x9   :  { %v37_v11 = vrot.slane %v21_v8, %v20_v7  ;;  %v29_v12 = vcombine.high %v21_v8, %v21_v8  ;;  %v44_v13 = vrot.slane %v28_v10, %v20_v7  ;;  %v30_v14 = vcombine.high %v28_v10, %v28_v10  ;;  %s148_s0 = scalar_lea.vmem %s134_s27, 256  ;;  %p153_p1 = scmp.lt.s32.totalorder %s134_s27, %s134_s27 }
   0xa   :  { %p149_p0 = scmp.ne.s32.totalorder %s134_s27, %s148_s0  ;;  %p154_p2 = scmp.lt.s32.totalorder %s148_s0, %s148_s0 }
   0xb   :  { %v74_v16 = vrot.slane %v37_v11, %v73_v9  ;;  %v51_v17 = vrot.slane %v29_v12, %v20_v7  ;;  %v59_v18 = vcombine.high %v37_v11, %v37_v11  ;;  %v90_v20 = vrot.slane %v44_v13, %v73_v9 }
   0xc   :  { %v58_v23 = vrot.slane %v30_v14, %v20_v7  ;;  %v60_v24 = vcombine.high %v44_v13, %v44_v13  ;;  %p155_p3 = por %p154_p2, %p153_p1 }
   0xd   :  { %v111_v25 = vadd.f32 %v74_v16, %v63_v15  ;;  %v78_v26 = vrot.slane %v51_v17, %v73_v9  ;;  %v82_v27 = vrot.slane %v59_v18, %v73_v9  ;;  %v61_v28 = vcombine.high %v51_v17, %v51_v17 }
   0xe   :  { %v115_v32 = vadd.f32 %v90_v20, %v67_v19  ;;  %v94_v33 = vrot.slane %v58_v23, %v73_v9  ;;  %v98_v34 = vrot.slane %v60_v24, %v73_v9  ;;  %v62_v35 = vcombine.high %v58_v23, %v58_v23  ;;  %p156_p4 = pnand %p155_p3, %p149_p0 }
   0xf   :  { %120 = vst.msk [vmem:[#allocation2] sm:$0x3] %vm119_vm0, %v111_v25  ;;  %v112_v36 = vadd.f32 %v78_v26, %v64_v21  ;;  %v113_v37 = vadd.f32 %v82_v27, %v65_v22  ;;  %v86_v38 = vrot.slane %v61_v28, %v73_v9 }
  0x10   :  { %124 = vst.msk [vmem:[#allocation2 + $0x8] sm:$0x3] %vm119_vm0, %v115_v32  ;;  %v116_v40 = vadd.f32 %v94_v33, %v68_v29  ;;  %v117_v41 = vadd.f32 %v98_v34, %v69_v30  ;;  %v102_v42 = vrot.slane %v62_v35, %v73_v9 }
  0x11   :  { %121 = vst.msk [vmem:[#allocation2 + $0x2] sm:$0x3] %vm119_vm0, %v112_v36  ;;  %122 = vst.msk [vmem:[#allocation2 + $0x4] sm:$0x3] %vm119_vm0, %v113_v37  ;;  %v114_v43 = vadd.f32 %v86_v38, %v66_v31 }
  0x12   :  { %125 = vst.msk [vmem:[#allocation2 + $0xa] sm:$0x3] %vm119_vm0, %v116_v40  ;;  %126 = vst.msk [vmem:[#allocation2 + $0xc] sm:$0x3] %vm119_vm0, %v117_v41  ;;  %v118_v44 = vadd.f32 %v102_v42, %v70_v39 }
  0x13   :  { %123 = vst.msk [vmem:[#allocation2 + $0x6] sm:$0x3] %vm119_vm0, %v114_v43 }
  0x14   :  { %127 = vst.msk [vmem:[#allocation2 + $0xe] sm:$0x3] %vm119_vm0, %v118_v44 }
  0x15   :  { %159 = shalt.err (!%p156_p4)
}
  0x16   :  { %s160_s30 = scalar_lea.hbm %s240_s2, 256 }
  0x17   :  { %p161_p5 = scmp.ne.s32.totalorder %s240_s2, %s160_s30  ;;  %p164_p6 = scmp.lt.u32.totalorder %s160_s30, %s240_s2 }
  0x19   :  { %p166_p7 = pnand %p164_p6, %p161_p5 }
  0x1b   :  { %169 = shalt.err (!%p166_p7)
}
  0x1c   :  { %s174_s7 = smov 32   ;;  %s175_s8 = smov 2  }
  0x1d   :  { %139 = dma.vmem_to_hbm [thread:$0]  %s134_s27, 256, %s240_s2, [#allocation3], %s174_s7, %s174_s7, %s175_s8  }
  0x1e   :  { %170 = dma.done.wait [#allocation3], 256  }
  0x1f   :  { %171 = vsyncadd [#allocation3], 4294967040 }
  0x20   :  { %143 = vsyncpa [#allocation3], 1 }

</bundles_post_ra>
